<compile_context>
chip_gen: v7x
topology: tpu7x:2x2x1
jax: 0.10.0
libtpu: 0.0.40
codegen_flags: <defaults>
</compile_context>

<pallas_src>
import jax
import jax.numpy as jnp
from jax.experimental import pallas as pl
from jax.experimental.pallas import tpu as pltpu


def _round_up(x, m):
    return ((x + m - 1) // m) * m


def _cdiv(a, b):
    return (a + b - 1) // b


def mlp_kernel(x_ref, w1_ref, b1_ref, w2_ref, b2_ref, o_ref):
    # x_ref:  (C_in, T)   — channels on sublanes, spatial on lanes
    # w1_ref: (C_mid, C_in),  b1_ref: (C_mid, 1)
    # w2_ref: (C_out, C_mid), b2_ref: (C_out, 1)
    # o_ref:  (C_out, T)  — lane-dense output tile
    x = x_ref[...]
    h = jnp.dot(w1_ref[...], x, preferred_element_type=jnp.float32)
    h = jnp.maximum(h + b1_ref[...].astype(jnp.float32), 0.0)        # bias + ReLU
    o = jnp.dot(w2_ref[...], h.astype(w2_ref.dtype),
                preferred_element_type=jnp.float32)
    o = o + b2_ref[...].astype(jnp.float32)
    o_ref[...] = o.astype(o_ref.dtype)


def mlp_pallas(x_nchw, w1, b1, w2, b2, *, max_tile_hw=65536, out_dtype=None):
    """1x1 Conv -> ReLU -> 1x1 Conv, fused, NCHW-native.

    x_nchw: (N, C_in, H, W); PyTorch Conv2d parameter layouts:
      w1: (C_mid, C_in, 1, 1), b1: (C_mid,),
      w2: (C_out, C_mid, 1, 1), b2: (C_out,).
    out_dtype: optional narrower output dtype (e.g. jnp.bfloat16) to cut the
      dominant output HBM stream; defaults to the input dtype (module-exact).
    """
    N, C_in, H, W = x_nchw.shape
    C_mid = w1.shape[0]
    C_out = w2.shape[0]
    HW = H * W
    if out_dtype is None:
        out_dtype = x_nchw.dtype

    # NCHW-native: pure reshape, no transpose (no extra HBM traffic).
    x3 = x_nchw.reshape(N, C_in, HW)

    # --- Spatial tile selection -------------------------------------------
    # Large lane-dense tiles amortize the per-grid-step pipeline overhead
    # (this kernel is purely HBM-bound).  Tiles are balanced across HW so the
    # ragged last block (masked by Pallas, no padding arrays, no output slice)
    # stays small.  For N == 1 we keep >=2 grid steps so both TensorCores of a
    # megacore chip get work.
    num_tiles = max(1, _cdiv(HW, max_tile_hw))
    if N == 1 and HW >= 256:
        num_tiles = max(num_tiles, 2)
    if num_tiles == 1:
        tile_hw = HW                                   # full-dim block (always legal)
    else:
        tile_hw = _round_up(_cdiv(HW, num_tiles), 128)  # lane-aligned balanced tiles
    grid_t = _cdiv(HW, tile_hw)

    # Conv2d 1x1 weights in their native (C_out, C_in) orientation (left-mult).
    w1_mat = w1[:, :, 0, 0]            # (C_mid, C_in)
    w2_mat = w2[:, :, 0, 0]            # (C_out, C_mid)
    b1_col = b1.reshape(C_mid, 1)
    b2_col = b2.reshape(C_out, 1)

    out3 = pl.pallas_call(
        mlp_kernel,
        out_shape=jax.ShapeDtypeStruct((N, C_out, HW), out_dtype),
        grid_spec=pltpu.PrefetchScalarGridSpec(
            num_scalar_prefetch=0,
            grid=(N, grid_t),
            in_specs=[
                # Leading batch dim squeezed -> kernel sees 2-D lane-dense tiles.
                pl.BlockSpec((pl.Squeezed(), C_in, tile_hw),
                             lambda n, t: (n, 0, t)),
                # Grid-invariant operands (constant index_map): kept resident,
                # no per-step re-DMA.
                pl.BlockSpec((C_mid, C_in), lambda n, t: (0, 0)),
                pl.BlockSpec((C_mid, 1), lambda n, t: (0, 0)),
                pl.BlockSpec((C_out, C_mid), lambda n, t: (0, 0)),
                pl.BlockSpec((C_out, 1), lambda n, t: (0, 0)),
            ],
            out_specs=pl.BlockSpec((pl.Squeezed(), C_out, tile_hw),
                                   lambda n, t: (n, 0, t)),
        ),
        compiler_params=pltpu.CompilerParams(
            dimension_semantics=("parallel", "parallel"),
            # Up to ~24 MiB live (double-buffered in/out blocks + f32 temps)
            # at tile_hw=65536: exceeds v5e's 16 MiB scoped default, fits
            # comfortably in 48 MiB, which stays under v7x's 64 MiB physical.
            vmem_limit_bytes=48 * 1024 * 1024,
        ),
    )(x3, w1_mat, b1_col, w2_mat, b2_col)

    # No padding was added, so a pure reshape restores NCHW.
    return out3.reshape(N, C_out, H, W)


def mlp_reference(x_nchw, w1, b1, w2, b2):
    """Pure-JAX reference mirroring the PyTorch forward (NCHW throughout)."""
    h = jnp.einsum("nchw,oc->nohw", x_nchw, w1[:, :, 0, 0]) + b1[None, :, None, None]
    h = jnp.maximum(h, 0.0)
    return jnp.einsum("nchw,oc->nohw", h, w2[:, :, 0, 0]) + b2[None, :, None, None]


if __name__ == "__main__":
    # Module config: MLP(in_nc=8, out_nc=16) -> mid_nc = min(8, 16) = 8
    in_nc, out_nc = 8, 16
    mid_nc = min(in_nc, out_nc)

    key = jax.random.PRNGKey(0)
    kx, kw1, kb1, kw2, kb2 = jax.random.split(key, 5)

    # Deterministic parameters (PyTorch Conv2d weight shapes: (out, in, 1, 1)).
    w1 = jax.random.normal(kw1, (mid_nc, in_nc, 1, 1), dtype=jnp.float32) * 0.1
    b1 = jax.random.normal(kb1, (mid_nc,), dtype=jnp.float32) * 0.1
    w2 = jax.random.normal(kw2, (out_nc, mid_nc, 1, 1), dtype=jnp.float32) * 0.1
    b2 = jax.random.normal(kb2, (out_nc,), dtype=jnp.float32) * 0.1

    # Cases: aligned single-tile, HW not a multiple of 128 (masked full-dim
    # block), and multi-tile with a ragged masked last block (N=1 megacore split).
    cases = [
        ((2, in_nc, 16, 16), 65536),   # HW=256, one tile per image
        ((2, in_nc, 10, 10), 65536),   # HW=100, unaligned full-dim block
        ((1, in_nc, 20, 23), 256),     # HW=460 > tile cap -> 2 tiles, ragged last
    ]
    for shape, cap in cases:
        x = jax.random.normal(kx, shape, dtype=jnp.float32)
        out = jax.block_until_ready(mlp_pallas(x, w1, b1, w2, b2, max_tile_hw=cap))
        ref = mlp_reference(x, w1, b1, w2, b2)
        assert out.shape == ref.shape, (out.shape, ref.shape)
        assert jnp.allclose(out, ref, atol=1e-5, rtol=1e-5), f"mismatch for {shape}"

    print("KERNEL_OK")
</pallas_src>

<mosaic_0001>
module attributes {stable_mosaic.version = 11 : i64} {
  func.func @mlp_kernel(%arg0: i32, %arg1: i32, %arg2: memref<1x8x256xf32, #tpu.memory_space<vmem>>, %arg3: memref<8x8xf32, #tpu.memory_space<vmem>>, %arg4: memref<8x1xf32, #tpu.memory_space<vmem>>, %arg5: memref<16x8xf32, #tpu.memory_space<vmem>>, %arg6: memref<16x1xf32, #tpu.memory_space<vmem>>, %arg7: memref<1x16x256xf32, #tpu.memory_space<vmem>>) attributes {dimension_semantics = [#tpu.dimension_semantics<parallel>, #tpu.dimension_semantics<parallel>], iteration_bounds = array<i64: 2, 1>, scalar_prefetch = 0 : i64, scratch_operands = 0 : i64, tpu.core_type = #tpu.core_type<tc>, window_params = [{transform_indices = @transform_0, window_bounds = array<i64: 1, 8, 256>}, {pipeline_mode = #tpu.pipeline_mode<synchronous>, transform_indices = @transform_1, window_bounds = array<i64: 8, 8>}, {pipeline_mode = #tpu.pipeline_mode<synchronous>, transform_indices = @transform_2, window_bounds = array<i64: 8, 1>}, {pipeline_mode = #tpu.pipeline_mode<synchronous>, transform_indices = @transform_3, window_bounds = array<i64: 16, 8>}, {pipeline_mode = #tpu.pipeline_mode<synchronous>, transform_indices = @transform_4, window_bounds = array<i64: 16, 1>}, {transform_indices = @transform_5, window_bounds = array<i64: 1, 16, 256>}]} {
    %c0 = arith.constant 0 : index
    %c0_0 = arith.constant 0 : index
    %c0_1 = arith.constant 0 : index
    %0 = vector.load %arg2[%c0, %c0_0, %c0_1] : memref<1x8x256xf32, #tpu.memory_space<vmem>>, vector<1x8x256xf32>
    %1 = vector.shape_cast %0 : vector<1x8x256xf32> to vector<8x256xf32>
    %c0_2 = arith.constant 0 : index
    %c0_3 = arith.constant 0 : index
    %2 = vector.load %arg3[%c0_2, %c0_3] : memref<8x8xf32, #tpu.memory_space<vmem>>, vector<8x8xf32>
    %cst = arith.constant dense<0.000000e+00> : vector<8x256xf32>
    %3 = tpu.matmul %2, %1, %cst {dimension_numbers = #tpu.dot_dimension_numbers<[1], [0], [0], [1], [0, 0, 1, 1], [], []>} : vector<8x8xf32>, vector<8x256xf32>, vector<8x256xf32> -> vector<8x256xf32>
    %c0_4 = arith.constant 0 : index
    %c0_5 = arith.constant 0 : index
    %4 = vector.load %arg4[%c0_4, %c0_5] : memref<8x1xf32, #tpu.memory_space<vmem>>, vector<8x1xf32>
    %5 = vector.broadcast %4 : vector<8x1xf32> to vector<8x256xf32>
    %6 = arith.addf %3, %5 : vector<8x256xf32>
    %cst_6 = arith.constant 0.000000e+00 : f32
    %7 = vector.broadcast %cst_6 : f32 to vector<8x256xf32>
    %8 = arith.maximumf %6, %7 : vector<8x256xf32>
    %c0_7 = arith.constant 0 : index
    %c0_8 = arith.constant 0 : index
    %9 = vector.load %arg5[%c0_7, %c0_8] : memref<16x8xf32, #tpu.memory_space<vmem>>, vector<16x8xf32>
    %cst_9 = arith.constant dense<0.000000e+00> : vector<16x256xf32>
    %10 = tpu.matmul %9, %8, %cst_9 {dimension_numbers = #tpu.dot_dimension_numbers<[1], [0], [0], [1], [0, 0, 1, 1], [], []>} : vector<16x8xf32>, vector<8x256xf32>, vector<16x256xf32> -> vector<16x256xf32>
    %c0_10 = arith.constant 0 : index
    %c0_11 = arith.constant 0 : index
    %11 = vector.load %arg6[%c0_10, %c0_11] : memref<16x1xf32, #tpu.memory_space<vmem>>, vector<16x1xf32>
    %12 = vector.broadcast %11 : vector<16x1xf32> to vector<16x256xf32>
    %13 = arith.addf %10, %12 : vector<16x256xf32>
    %c0_12 = arith.constant 0 : index
    %c0_13 = arith.constant 0 : index
    %c0_14 = arith.constant 0 : index
    %14 = vector.load %arg7[%c0_12, %c0_13, %c0_14] : memref<1x16x256xf32, #tpu.memory_space<vmem>>, vector<1x16x256xf32>
    %15 = vector.shape_cast %14 : vector<1x16x256xf32> to vector<16x256xf32>
    %16 = vector.shape_cast %13 : vector<16x256xf32> to vector<1x16x256xf32>
    tpu.vector_store %arg7[%c0_12, %c0_13, %c0_14], %16 {strides = array<i32>} : memref<1x16x256xf32, #tpu.memory_space<vmem>>, vector<1x16x256xf32>,
    return
  }
  func.func @transform_0(%arg0: i32, %arg1: i32) -> (i32, i32, i32) {
    %c0_i32 = arith.constant 0 : i32
    %c0_i32_0 = arith.constant 0 : i32
    return %arg0, %c0_i32, %arg1 : i32, i32, i32
  }
  func.func @transform_1(%arg0: i32, %arg1: i32) -> (i32, i32) {
    %c0_i32 = arith.constant 0 : i32
    %c0_i32_0 = arith.constant 0 : i32
    %c0_i32_1 = arith.constant 0 : i32
    return %c0_i32, %c0_i32_0 : i32, i32
  }
  func.func @transform_2(%arg0: i32, %arg1: i32) -> (i32, i32) {
    %c0_i32 = arith.constant 0 : i32
    %c0_i32_0 = arith.constant 0 : i32
    %c0_i32_1 = arith.constant 0 : i32
    return %c0_i32, %c0_i32_0 : i32, i32
  }
  func.func @transform_3(%arg0: i32, %arg1: i32) -> (i32, i32) {
    %c0_i32 = arith.constant 0 : i32
    %c0_i32_0 = arith.constant 0 : i32
    %c0_i32_1 = arith.constant 0 : i32
    return %c0_i32, %c0_i32_0 : i32, i32
  }
  func.func @transform_4(%arg0: i32, %arg1: i32) -> (i32, i32) {
    %c0_i32 = arith.constant 0 : i32
    %c0_i32_0 = arith.constant 0 : i32
    %c0_i32_1 = arith.constant 0 : i32
    return %c0_i32, %c0_i32_0 : i32, i32
  }
  func.func @transform_5(%arg0: i32, %arg1: i32) -> (i32, i32, i32) {
    %c0_i32 = arith.constant 0 : i32
    %c0_i32_0 = arith.constant 0 : i32
    return %arg0, %c0_i32, %arg1 : i32, i32, i32
  }
}

</mosaic_0001>

<bundles_post_ra>
// kernel: tpu_custom_call.1
= control target key start
LH: loop header
LB: loop body
LE: loop exit
PB: predicated region body
PF: predicated region fallthrough
CT: control target
= control target key end

     0   :  { %10 = vsyncpa [#allocation3], 0  ;;  %s866_s0 = inlined_call_operand.vmem [shape: f32[2,8,256], index: 0, kind: input, shape index: {}]   ;;  %s867_s1 = inlined_call_operand.vmem [shape: f32[8,8], index: 1, kind: input, shape index: {}]   ;;  %s868_s2 = inlined_call_operand.vmem [shape: f32[8,1], index: 2, kind: input, shape index: {}]   ;;  %s869_s3 = inlined_call_operand.vmem [shape: f32[16,8], index: 3, kind: input, shape index: {}]   ;;  %s870_s4 = inlined_call_operand.vmem [shape: f32[16,1], index: 4, kind: input, shape index: {}]   ;;  %s871_s5 = inlined_call_operand.hbm [shape: f32[2,16,256], index: 5, kind: output, shape index: {}]  }
   0x1   :  { %12 = vsyncpa [#allocation3 + $0x1], 0  ;;  %s730_s18 = smov 0   ;;  %s732_s19 = smov 0  }
   0x2   :  { %s734_s20 = smov 0   ;;  %s736_s21 = smov 0  }
   0x3   :  { %s738_s22 = smov 0   ;;  %s740_s23 = smov 0  }
   0x4 LB: > { %s536_s24 = sadd.s32 4294967295, %s693_s23   ;;  %s537_s25 = sadd.s32 4294967294, %s693_s23   ;;  %s693_s23 = sphi %s740_s23, %s18_s23   ;;  %s689_s22 = sphi %s738_s22, %s878_s22   ;;  %s685_s21 = sphi %s736_s21, %s877_s21   ;;  %s681_s20 = sphi %s734_s20, %s876_s20   ;;  %s677_s19 = sphi %s732_s19, %s875_s19   ;;  %s673_s18 = sphi %s730_s18, %s874_s18  }
   0x5   : > { %s30_s26 = sadd.s32 1, %s689_s22  ;;  %s151_s27 = sadd.s32 1, %s681_s20 }
   0x6   : > { %p32_p0 = scmp.ge.s32.totalorder %s30_s26, 2  ;;  %p161_p1 = scmp.ne.s32.totalorder %s681_s20, %s677_s19 }
   0x7   : > { %p162_p2 = scmp.eq.s32.totalorder %s536_s24, 1  ;;  %p167_p3 = scmp.ne.s32.totalorder %s677_s19, %s673_s18 }
   0x8   : > { %s880_s26 = smov (%p32_p0, %s30_s26), 0  ;;  %p168_p5 = scmp.eq.s32.totalorder %s537_s25, 1 }
   0x9   : > { %p770_p4 = por %p162_p2, %p161_p1  ;;  %s146_s29 = ssub.s32 %s689_s22, %s880_s26 }
   0xa   : > { %p540_p6 = scmp.ge.s32.totalorder %s693_s23, 1  ;;  %p149_p7 = scmp.eq.s32.totalorder %s146_s29, 0 }
   0xb   : > { %p777_p8 = por %p168_p5, %p167_p3  ;;  %p211_p9 = scmp.lt.s32.totalorder %s693_s23, 3 }
   0xc   : > { %s783_s6 = scalar_select %p149_p7, %s681_s20, %s151_s27  }
   0xd   : > { %p212_p10 = pnand %p540_p6, %p211_p9 }
   0xe   : > { %p244_p11 = scmp.lt.s32.totalorder (!%p212_p10), %s685_s21, 1  ;;  %v257_v0 = vld [vmem:[%s868_s2] sm:$0xff] (!%p212_p10)  ;;  %v695_v1 = vmov (!%p212_p10), 0.0   ;;  %v696_v2 = vmov (!%p212_p10), 0   ;;  %vm263_vm0 = vcmask (!%p212_p10), 64512   ;;  %v343_v7 = vld [vmem:[%s870_s4 + $0x8] sm:$0xff] (!%p212_p10) }
   0xf   : > { %215 = sbr.rel (%p212_p10) target bundleno = 482 (0x1e2), region = 40  ;;  %331 = vmatprep.mubr.f32.mxu0 (!%p212_p10), %v695_v1  ;;  %613 = vset.pattern.permute.xlu0 (!%p212_p10), %v696_v2  ;;  %v342_v3 = vld [vmem:[%s870_s4] sm:$0xff] (!%p212_p10)  ;;  %v341_v16 = vld [vmem:[%s869_s3 + $0x8] sm:$0xff] (!%p212_p10)  ;;  %s553_s13 = sshll.u32 (!%p212_p10), %s685_s21, 9 }
  0x10   : > { %260 = vperm.xlu0 (!%p212_p10), %613, %v257_v0   ;;  %424 = vmatprep.mubr.f32.mxu1 (!%p212_p10), %v695_v1  ;;  %v256_v6 = vld [vmem:[%s867_s1] sm:$0xff] (!%p212_p10)  ;;  %s818_s16 = scalar_lea.hbm (!%p212_p10), %s871_s5, %s553_s13  ;;  %s697_s24 = smov (!%p212_p10), [#allocation2]  }
  0x11   : > { %614 = vset.pattern.permute.xlu1 (!%p212_p10), %v696_v2  ;;  %v340_v15 = vld [vmem:[%s869_s3] sm:$0xff] (!%p212_p10)  ;;  %s619_s25 = sshll.u32 (!%p212_p10), %s697_s24, 4  ;;  %s620_s25 = int_to_ptr.vmem [resolvable:$false] %s619_s25 }
  0x12   : > { %351 = vperm.xlu1 (!%p212_p10), %614, %v343_v7   ;;  %s621_s27 = scalar_lea.vmem (!%p212_p10), %s620_s25, 1024 }
  0x14   : > { %346 = vperm.xlu0 (!%p212_p10), %613, %v342_v3  }
  0x16   : > { %s245_s9 = scalar_select %p244_p11, %s685_s21, 1 }
  0x18   : > { %s552_s12 = sshll.u32 %s245_s9, 4  ;;  %s240_s9 = sand.u32 1, %s677_s19  }
  0x19   : > { %s251_s15 = scalar_lea.vmem %s866_s0, %s552_s12  ;;  %s541_s10 = sshll.u32 %s240_s9, 5 }
  0x1a   : > { %v255_v4 = vld [vmem:[%s251_s15 + $0x8] sm:$0xff]  ;;  %v254_v5 = vld [vmem:[%s251_s15] sm:$0xff]  ;;  %s242_s11 = scalar_lea.vmem [#allocation2], %s541_s10  ;;  %s820_s17 = scalar_lea.sflag [#allocation3], %s240_s9 }
  0x1b   : > { %267 = vmatprep.subr.mxu0 %v255_v4  ;;  %s457_s12 = sshll.u32 %s242_s11, 4  ;;  %s813_s12 = int_to_ptr.vmem [resolvable:$true] %s457_s12 }
  0x1c   : > { %268 = vmatpush1.msra.mxu0 %v254_v5  ;;  %s615_s21 = scalar_lea.vmem %s813_s12, 512  ;;  %p622_p1 = scmp.lt.s32.totalorder %s813_s12, %s620_s25 }
  0x1d   : > { %544 = vmatmul.mubr.msk.f32.vlgmr.msra.gmra.mrb[0].mxu0 %vm263_vm0, %v256_v6  ;;  %p616_p12 = scmp.ne.s32.totalorder %s813_s12, %s615_s21  ;;  %p623_p2 = scmp.lt.s32.totalorder %s621_s27, %s615_s21 }
  0x1f   : > { %p617_p13 = pnand %p616_p12, %p770_p4  ;;  %p624_p3 = por %p623_p2, %p622_p1 }
  0x21   : > { %p618_p0 = pneg %p617_p13 }
  0x23   : > { %p625_p5 = pnand %p624_p3, %p618_p0 }
  0x8f   : > { %v261_v8 = vpop.permute.xlu0 %260 }
  0x91   : > { %v352_v22 = vpop.permute.xlu1 %351 }
  0x93   : > { %v347_v17 = vpop.permute.xlu0 %346 }
  0xf0   : > { %v333_v9 = vpop.f32.mrb[0].mxu0 }
  0xf1   : > { %v334_v10 = vadd.f32 %v333_v9, %v261_v8  ;;  %v335_v11 = vpop.f32.mrb[1].mxu0 }
  0xf2   : > { %v336_v12 = vadd.f32 %v335_v11, %v261_v8 }
  0xf3   : > { %v338_v14 = vmax.f32 %v334_v10, 0.0 }
  0xf4   : > { %v339_v13 = vmax.f32 %v336_v12, 0.0 }
  0xf6   : > { %360 = vmatprep.subr.mxu1 %v339_v13 }
  0xf7   : > { %361 = vmatpush1.msra.mxu1 %v338_v14 }
  0xf8   : > { %545 = vmatmul.mubr.msk.f32.vlgmr.msra.gmra.mrb[0].mxu1 %vm263_vm0, %v340_v15 }
  0xf9   : > { %430 = vmatprep.mubr.f32.mxu1 %v695_v1 }
  0xfc   : > { %546 = vmatmul.mubr.msk.f32.gmra.mrb[2].mxu1 %vm263_vm0, %v341_v16 }
 0x1cb   : > { %v426_v18 = vpop.f32.mrb[0].mxu1 }
 0x1cc   : > { %v427_v19 = vadd.f32 %v426_v18, %v347_v17  ;;  %v428_v20 = vpop.f32.mrb[1].mxu1 }
 0x1cd   : > { %v429_v21 = vadd.f32 %v428_v20, %v347_v17 }
 0x1ce   : > { %437 = vst [vmem:[%s242_s11] sm:$0xff] %v427_v19 }
 0x1cf   : > { %438 = vst [vmem:[%s242_s11 + $0x8] sm:$0xff] %v429_v21  ;;  %v432_v23 = vpop.f32.mrb[2].mxu1 }
 0x1d0   : > { %v433_v24 = vadd.f32 %v432_v23, %v352_v22  ;;  %v434_v25 = vpop.f32.mrb[3].mxu1 }
 0x1d1   : > { %v435_v26 = vadd.f32 %v434_v25, %v352_v22 }
 0x1d2   : > { %439 = vst [vmem:[%s242_s11 + $0x10] sm:$0xff] %v433_v24 }
 0x1d3   : > { %440 = vst [vmem:[%s242_s11 + $0x18] sm:$0xff] %v435_v26 }
 0x1d4   : > { %628 = shalt.err (!%p625_p5)
}
 0x1d5   : > { %s629_s29 = scalar_lea.hbm %s818_s16, 512  ;;  %s633_s9 = scalar_lea.hbm %s871_s5, 1024 }
 0x1d6   : > { %p630_p6 = scmp.ne.s32.totalorder %s818_s16, %s629_s29  ;;  %p634_p10 = scmp.lt.u32.totalorder %s818_s16, %s871_s5 }
 0x1d7   : > { %p635_p11 = scmp.lt.u32.totalorder %s633_s9, %s629_s29  ;;  %p637_p13 = scmp.lt.u32.totalorder %s629_s29, %s818_s16 }
 0x1d8   : > { %p631_p7 = pnand %p630_p6, %p770_p4 }
 0x1d9   : > { %p636_p12 = por %p635_p11, %p634_p10 }
 0x1da   : > { %p632_p9 = pneg %p631_p7 }
 0x1db   : > { %p638_p0 = por %p637_p13, %p636_p12 }
 0x1dd   : > { %p639_p1 = pnand %p638_p0, %p632_p9 }
 0x1df   : > { %642 = shalt.err (!%p639_p1)
}
 0x1e0   : > { %s698_s13 = smov 256   ;;  %s699_s14 = smov 16  }
 0x1e1   : > { %554 = dma.vmem_to_hbm [thread:$0]  (%p770_p4), %s813_s12, 512, %s818_s16, %s820_s17, %s698_s13, %s698_s13, %s699_s14  }
 0x1e2 PF: > { %p560_p2 = scmp.ge.s32.totalorder %s693_s23, 2  ;;  %s472_s15 = sand.u32 1, %s673_s18  }
 0x1e3   : > { %s473_s21 = scalar_lea.sflag [#allocation3], %s472_s15 }
 0x1e4   : > { %p557_p3 = pnand %p560_p2, %p777_p8 }
 0x1e6   : > { %668 = dma.done.wait (!%p557_p3), %s473_s21, 512  }
 0x1e7   : > { %670 = vsyncadd (!%p557_p3), %s473_s21, 4294966784  ;;  %s18_s23 = sadd.s32 1, %s693_s23   ;;  %s874_s18 = smov %s677_s19 }
 0x1e8   : > { %p15_p5 = scmp.ge.s32.totalorder %s18_s23, 4   ;;  %s875_s19 = smov %s681_s20 }
 0x1e9   : > { %s876_s20 = smov %s783_s6  ;;  %s877_s21 = smov %s689_s22 }
 0x1ea   : > { %s878_s22 = smov %s880_s26  ;;  %17 = sbr.rel (!%p15_p5) target bundleno = 4 (0x4), region = 75 }
 0x1f1   :  { %478 = vsyncpa [#allocation3], 1 }
 0x1f2   :  { %480 = vsyncpa [#allocation3 + $0x1], 1 }

</bundles_post_ra>
